<compile_context>
chip_gen: v5e
topology: v5e:2x2
jax: 0.10.0
libtpu: 0.0.40
codegen_flags: <defaults>
</compile_context>

<pallas_src>
from functools import partial

import jax
import jax.numpy as jnp
from jax.experimental import pallas as pl
from jax.experimental.pallas import tpu as pltpu


# ----------------------------- Pallas kernel -------------------------------

def _ibot_patch_kernel(n_valid_tail, use_mxu_csum,
                       inv_temps_ref, w_ref, *rest):
    """Fused iBOT patch-loss tile kernel.

    n_valid_tail : None if M divides evenly into tiles, else the number of
                   valid rows in the LAST tile (static Python int).
    use_mxu_csum : static; True for sub-32-bit activations (MXU center sum).
    """
    if use_mxu_csum:
        (mask_row_ref, teacher_ref, student_ref, center_ref,
         loss_ref, csum_ref) = rest
    else:
        teacher_ref, student_ref, center_ref, loss_ref, csum_ref = rest
        mask_row_ref = None

    inv_t = inv_temps_ref[0]                               # 1 / teacher_temp
    inv_s = inv_temps_ref[1]                               # 1 / student_temp

    w = w_ref[...]                                         # (TM, 1) f32: mask / mask_weight
    t_f32 = teacher_ref[...].astype(jnp.float32)           # (TM, D) f32 compute copy

    # --- teacher: centered, temperature-scaled softmax (un-normalized) ------
    xt = (t_f32 - center_ref[...]) * inv_t
    xt = xt - jnp.max(xt, axis=-1, keepdims=True)
    xt_exp = jnp.exp(xt)
    xt_sum = jnp.sum(xt_exp, axis=-1, keepdims=True)       # (TM, 1)

    # --- student: temperature-scaled log-softmax pieces ---------------------
    xs = student_ref[...].astype(jnp.float32) * inv_s
    xs_sub = xs - jnp.max(xs, axis=-1, keepdims=True)
    xs_lse = jnp.log(jnp.sum(jnp.exp(xs_sub), axis=-1, keepdims=True))

    # --- per-row cross entropy -----------------------------------------------
    #   sum_d softmax(t) * (lse(s) - (s - max s))
    # = lse(s) - <exp(t - max t), s - max s> / sum_d exp(t - max t)
    dots = jnp.sum(xt_exp * xs_sub, axis=-1, keepdims=True)
    ce = xs_lse - dots * pl.reciprocal(xt_sum, approx=False)        # (TM, 1)

    def emit(valid):
        """Write per-tile partials.  `valid` is None on full tiles, else a
        (TM, 1) bool guard zeroing rows past the end of the real data (the
        partial last input block may contain garbage, incl. NaN/Inf)."""
        if use_mxu_csum:
            t_in = teacher_ref[...]                         # raw (bf16) MXU operand
            if valid is not None:
                t_in = jnp.where(valid, t_in, jnp.zeros_like(t_in))
            csum = jnp.dot(mask_row_ref[0], t_in,           # (1, TM) @ (TM, D)
                           preferred_element_type=jnp.float32)
        else:
            mask_col = (w != 0.0).astype(jnp.float32)       # per-row; mask in {0, 1}
            prod = t_f32 * mask_col
            if valid is not None:
                prod = jnp.where(valid, prod, 0.0)
            csum = jnp.sum(prod, axis=0, keepdims=True)     # (1, D)
        csum_ref[...] = csum.reshape(csum_ref.shape)

        lrow = ce * w                                       # (TM, 1), tiny per-row work
        if valid is not None:
            lrow = jnp.where(valid, lrow, 0.0)
        loss_ref[...] = jnp.sum(lrow, axis=0, keepdims=True).reshape(loss_ref.shape)

    if n_valid_tail is None:
        emit(None)                                          # no ragged tail anywhere
    else:
        last = pl.num_programs(0) - 1

        @pl.when(pl.program_id(0) != last)
        def _():
            emit(None)                                      # fast path, no guards

        @pl.when(pl.program_id(0) == last)
        def _():
            rows = jax.lax.broadcasted_iota(jnp.int32, (teacher_ref.shape[0], 1), 0)
            emit(rows < n_valid_tail)


# ------------------------- tiling / VMEM heuristics -------------------------

def _vmem_budget_bytes():
    """Generation-aware scoped-VMEM limit: 128 MiB parts (v5e/v6e) -> ~100 MiB,
    64 MiB parts (v7x) -> ~36 MiB, conservative fallback if the query fails."""
    try:
        cap = int(pltpu.get_tpu_info().vmem_capacity_bytes)
    except Exception:
        cap = 64 * 1024 * 1024
    return max(32 * 1024 * 1024, min(100 * 1024 * 1024, cap - 28 * 1024 * 1024))


def _default_tile_rows(D, dtype, vmem_limit_bytes):
    """Largest row tile fitting ~70% of the scoped VMEM limit."""
    in_bytes = jnp.dtype(dtype).itemsize
    # double-buffered teacher+student input tiles + ~10 live fp32 (tm, D)
    # temporaries (f32 casts, xt, xt_exp, xs, xs_sub, exp(xs_sub), products, ...)
    per_row = (2 * 2 * in_bytes + 10 * 4) * D
    budget = int(vmem_limit_bytes * 0.7) - (1 << 20)       # ~1 MiB for side blocks
    tm = budget // per_row
    return max(8, (int(tm) // 8) * 8)


def _choose_tile_rows(M, target):
    """Single tile if it fits, else prefer a near-target multiple-of-8 divisor
    of M (no padding, no guarded tile), else fall back to the ragged path."""
    if M <= target:
        return M
    target = max(8, (target // 8) * 8)
    lo = max(8, (target * 3) // 4)
    for t in range(target, lo - 1, -8):
        if M % t == 0:
            return t
    return target


# --------------------------------- runner -----------------------------------

def _run_ibot_kernel(teacher_flat, student_flat, center_2d, w_flat, mask_flat,
                     inv_teacher_temp, inv_student_temp, tm):
    """teacher_flat/student_flat: (M, D); w_flat: (M, 1); mask_flat: (M,)."""
    M, D = teacher_flat.shape
    act_dtype = teacher_flat.dtype
    use_mxu_csum = jnp.dtype(act_dtype).itemsize < 4        # bf16/fp16 activations

    vmem_limit = _vmem_budget_bytes()
    if tm is None:
        tm = _default_tile_rows(D, act_dtype, vmem_limit)
    tm = _choose_tile_rows(M, int(tm))

    grid_m = pl.cdiv(M, tm)
    Mp = grid_m * tm
    n_valid_tail = None if Mp == M else M - (grid_m - 1) * tm

    if Mp != M:
        # Only the tiny per-row vectors get padded; the big activations stay
        # un-copied and the kernel guards the last partial block in-place.
        pad = Mp - M
        w_flat = jnp.pad(w_flat, ((0, pad), (0, 0)))
        mask_flat = jnp.pad(mask_flat, (0, pad))

    inv_temps = jnp.stack([jnp.asarray(inv_teacher_temp, jnp.float32),
                           jnp.asarray(inv_student_temp, jnp.float32)])

    args = [inv_temps, w_flat]
    in_specs = [
        pl.BlockSpec(memory_space=pltpu.MemorySpace.SMEM),   # reciprocal temperatures
        pl.BlockSpec((tm, 1), lambda i: (i, 0)),             # per-row loss weight w
    ]
    if use_mxu_csum:
        mask_rows = mask_flat.reshape(grid_m, 1, tm).astype(act_dtype)
        args.append(mask_rows)
        in_specs.append(pl.BlockSpec((1, 1, tm), lambda i: (i, 0, 0)))
    args += [teacher_flat, student_flat, center_2d]
    in_specs += [
        pl.BlockSpec((tm, D), lambda i: (i, 0)),             # teacher tile
        pl.BlockSpec((tm, D), lambda i: (i, 0)),             # student tile
        pl.BlockSpec((1, D), lambda i: (0, 0)),              # center (resident)
    ]

    in_bytes = jnp.dtype(act_dtype).itemsize
    cost = pl.CostEstimate(
        flops=int(12 * M * D),
        transcendentals=int(2 * M * D),
        bytes_accessed=int(2 * M * D * in_bytes + Mp * 4 + D * 4
                           + grid_m * (D + 1) * 4),
    )

    kernel = partial(_ibot_patch_kernel, n_valid_tail, use_mxu_csum)

    loss_parts, csum_parts = pl.pallas_call(
        kernel,
        out_shape=(
            jax.ShapeDtypeStruct((grid_m, 1, 1), jnp.float32),   # per-tile loss partials
            jax.ShapeDtypeStruct((grid_m, 1, D), jnp.float32),   # per-tile sum(teacher*mask)
        ),
        grid=(grid_m,),
        in_specs=in_specs,
        out_specs=(
            pl.BlockSpec((1, 1, 1), lambda i: (i, 0, 0)),
            pl.BlockSpec((1, 1, D), lambda i: (i, 0, 0)),
        ),
        compiler_params=pltpu.CompilerParams(
            dimension_semantics=("parallel",),               # no resident accumulator
            vmem_limit_bytes=int(vmem_limit),
        ),
        cost_estimate=cost,
    )(*args)

    return loss_parts, csum_parts


# ------------------------- module-level glue (JAX) --------------------------

def _teacher_temp_schedule(step, warmup_temp, final_temp, warmup_steps, total_steps):
    # LinearWarmupCosineDecayScheduler with base_value == final_value:
    # linear warmup then constant (cosine between equal endpoints is constant).
    step_f = jnp.asarray(step, jnp.float32)
    warm = warmup_temp + (final_temp - warmup_temp) * step_f / max(warmup_steps, 1)
    return jnp.where(step_f < warmup_steps, warm, jnp.float32(final_temp))


@partial(jax.jit, static_argnames=("student_temp", "center_momentum",
                                   "warmup_teacher_temp", "teacher_temp",
                                   "warmup_teacher_temp_steps", "total_steps",
                                   "no_slice", "tm"))
def ibot_patch_loss(teacher_global_output, student_global_output, student_masks,
                    center, step,
                    *, student_temp=0.1, center_momentum=0.9,
                    warmup_teacher_temp=0.04, teacher_temp=0.07,
                    warmup_teacher_temp_steps=10, total_steps=100,
                    no_slice=False, tm=None):
    """Returns (ibot_loss, new_center, new_step)."""
    B, N, S, D = teacher_global_output.shape
    assert student_masks.shape == (B, N, S - 1)

    # All S tokens (CLS included) go through the kernel with the CLS mask set
    # to zero.  Every CLS contribution is mask-gated (loss, mask-weight, center
    # sum), so this is numerically identical to the reference's [:, :, 1:]
    # slice without materializing a strided copy; for no_slice=True it is
    # exactly what the PyTorch module does.
    del no_slice
    cls_mask = jnp.zeros((B, N, 1), dtype=jnp.float32)
    mask_full = jnp.concatenate([cls_mask, student_masks.astype(jnp.float32)], axis=2)

    M = B * N * S
    teacher_flat = teacher_global_output.reshape(M, D)     # contiguous reshape, no copy
    student_flat = student_global_output.reshape(M, D)
    center_2d = center.reshape(1, D).astype(jnp.float32)

    # per-(b, n) mask weight, folded into a per-row loss weight w = mask / weight
    mask_weight = jnp.maximum(jnp.sum(mask_full, axis=-1, keepdims=True), 1.0)  # (B,N,1)
    w_flat = (mask_full / mask_weight).reshape(M, 1)
    mask_flat = mask_full.reshape(M)

    t_temp = _teacher_temp_schedule(step, warmup_teacher_temp, teacher_temp,
                                    warmup_teacher_temp_steps, total_steps)
    inv_t = 1.0 / t_temp
    inv_s = 1.0 / student_temp

    loss_parts, csum_parts = _run_ibot_kernel(teacher_flat, student_flat, center_2d,
                                              w_flat, mask_flat, inv_t, inv_s, tm)

    # final scalar reductions
    ibot_loss = jnp.sum(loss_parts) / (B * N)

    # center EMA update from the kernel's masked-teacher partial sums
    total_masks = jnp.sum(mask_full)
    batch_center = jnp.sum(csum_parts, axis=(0, 1)) / total_masks
    new_center = center * center_momentum + batch_center * (1.0 - center_momentum)

    return ibot_loss, new_center, step + 1


# ------------------------------ reference (JAX) -----------------------------

def _reference(teacher, student, masks, center, step, **cfg):
    B, N, S, D = teacher.shape
    t = teacher[:, :, 1:].reshape(B, N * (S - 1), D).astype(jnp.float32)
    s = (student[:, :, 1:].astype(jnp.float32) / cfg["student_temp"]).reshape(B, N * (S - 1), D)
    t_temp = _teacher_temp_schedule(step, cfg["warmup_teacher_temp"], cfg["teacher_temp"],
                                    cfg["warmup_teacher_temp_steps"], cfg["total_steps"])
    p_t = jax.nn.softmax((t - center[None, None, :]) / t_temp, axis=-1)
    log_p_s = jax.nn.log_softmax(s, axis=-1)
    per_tok = jnp.sum(-p_t * log_p_s, axis=-1)                       # (B, N*(S-1))
    m = masks.astype(jnp.float32)                                    # (B, N, S-1)
    m_flat = m.reshape(B, N * (S - 1))
    mw = jnp.maximum(jnp.sum(m, axis=-1, keepdims=True), 1.0)
    mw_flat = jnp.broadcast_to(mw, m.shape).reshape(B, N * (S - 1))
    loss = jnp.sum(per_tok * m_flat / mw_flat) / (B * N)
    batch_center = jnp.sum(t * m_flat[..., None], axis=(0, 1)) / jnp.sum(m_flat)
    new_center = center * cfg["center_momentum"] + batch_center * (1 - cfg["center_momentum"])
    return loss, new_center


# ---------------------------------- main ------------------------------------

if __name__ == "__main__":
    cfg = dict(student_temp=0.1, center_momentum=0.9,
               warmup_teacher_temp=0.04, teacher_temp=0.07,
               warmup_teacher_temp_steps=10, total_steps=100)

    B, N, S, D = 2, 2, 9, 256          # 8 patch tokens per image after the CLS token
    key = jax.random.PRNGKey(0)
    k1, k2, k3 = jax.random.split(key, 3)

    teacher = jax.random.normal(k1, (B, N, S, D), dtype=jnp.float32)
    student = jax.random.normal(k2, (B, N, S, D), dtype=jnp.float32)
    masks = (jax.random.uniform(k3, (B, N, S - 1)) > 0.5).astype(jnp.float32)

    center = jnp.zeros((D,), dtype=jnp.float32)        # buffer init (zeros), as in __init__
    step = jnp.zeros((), dtype=jnp.int32)

    ref_loss, ref_center = _reference(teacher, student, masks, center, step, **cfg)

    # 1) f32, auto tile: single tile, unguarded fast path, VPU center sum
    loss, new_center, new_step = ibot_patch_loss(
        teacher, student, masks, center, step, **cfg, no_slice=False)
    jax.block_until_ready((loss, new_center, new_step))
    assert jnp.allclose(loss, ref_loss, rtol=1e-4, atol=1e-5), (loss, ref_loss)
    assert jnp.allclose(new_center, ref_center, rtol=1e-4, atol=1e-5)

    # 2) f32, small explicit tile -> ragged tail (guarded last tile only) + no_slice
    loss2, new_center2, _ = ibot_patch_loss(
        teacher, student, masks, center, step, **cfg, no_slice=True, tm=16)
    jax.block_until_ready((loss2, new_center2))
    assert jnp.allclose(loss2, ref_loss, rtol=1e-4, atol=1e-5), (loss2, ref_loss)
    assert jnp.allclose(new_center2, ref_center, rtol=1e-4, atol=1e-5)

    # 3) bf16 activations, auto tile: MXU center-sum fast path
    teacher_bf = teacher.astype(jnp.bfloat16)
    student_bf = student.astype(jnp.bfloat16)
    ref_loss_bf, ref_center_bf = _reference(teacher_bf.astype(jnp.float32),
                                            student_bf.astype(jnp.float32),
                                            masks, center, step, **cfg)
    loss3, new_center3, _ = ibot_patch_loss(
        teacher_bf, student_bf, masks, center, step, **cfg, no_slice=False)
    jax.block_until_ready((loss3, new_center3))
    assert jnp.allclose(loss3, ref_loss_bf, rtol=1e-4, atol=1e-5), (loss3, ref_loss_bf)
    assert jnp.allclose(new_center3, ref_center_bf, rtol=1e-4, atol=1e-5)

    # 4) bf16 activations with a ragged tail: guarded MXU path on the last tile
    loss4, new_center4, _ = ibot_patch_loss(
        teacher_bf, student_bf, masks, center, step, **cfg, no_slice=False, tm=16)
    jax.block_until_ready((loss4, new_center4))
    assert jnp.allclose(loss4, ref_loss_bf, rtol=1e-4, atol=1e-5), (loss4, ref_loss_bf)
    assert jnp.allclose(new_center4, ref_center_bf, rtol=1e-4, atol=1e-5)

    print("KERNEL_OK")
</pallas_src>

<mosaic_0001>
module attributes {stable_mosaic.version = 11 : i64} {
  func.func @_ibot_patch_kernel(%arg0: i32, %arg1: memref<2xf32, #tpu.memory_space<smem>>, %arg2: memref<36x1xf32, #tpu.memory_space<vmem>>, %arg3: memref<36x256xf32, #tpu.memory_space<vmem>>, %arg4: memref<36x256xf32, #tpu.memory_space<vmem>>, %arg5: memref<1x256xf32, #tpu.memory_space<vmem>>, %arg6: memref<1x1x1xf32, #tpu.memory_space<vmem>>, %arg7: memref<1x1x256xf32, #tpu.memory_space<vmem>>) attributes {dimension_semantics = [#tpu.dimension_semantics<parallel>], iteration_bounds = array<i64: 1>, scalar_prefetch = 0 : i64, scratch_operands = 0 : i64, tpu.core_type = #tpu.core_type<tc>, window_params = [{transform_indices = @transform_0, window_bounds = array<i64: 2>}, {transform_indices = @transform_1, window_bounds = array<i64: 36, 1>}, {transform_indices = @transform_2, window_bounds = array<i64: 36, 256>}, {transform_indices = @transform_3, window_bounds = array<i64: 36, 256>}, {pipeline_mode = #tpu.pipeline_mode<synchronous>, transform_indices = @transform_4, window_bounds = array<i64: 1, 256>}, {transform_indices = @transform_5, window_bounds = array<i64: 1, 1, 1>}, {transform_indices = @transform_6, window_bounds = array<i64: 1, 1, 256>}]} {
    %c0 = arith.constant 0 : index
    %0 = memref.load %arg1[%c0] : memref<2xf32, #tpu.memory_space<smem>>
    %c1 = arith.constant 1 : index
    %1 = memref.load %arg1[%c1] : memref<2xf32, #tpu.memory_space<smem>>
    %c0_0 = arith.constant 0 : index
    %c0_1 = arith.constant 0 : index
    %2 = vector.load %arg2[%c0_0, %c0_1] : memref<36x1xf32, #tpu.memory_space<vmem>>, vector<36x1xf32>
    %c0_2 = arith.constant 0 : index
    %c0_3 = arith.constant 0 : index
    %3 = vector.load %arg3[%c0_2, %c0_3] : memref<36x256xf32, #tpu.memory_space<vmem>>, vector<36x256xf32>
    %c0_4 = arith.constant 0 : index
    %c0_5 = arith.constant 0 : index
    %4 = vector.load %arg5[%c0_4, %c0_5] : memref<1x256xf32, #tpu.memory_space<vmem>>, vector<1x256xf32>
    %5 = vector.broadcast %4 : vector<1x256xf32> to vector<36x256xf32>
    %6 = arith.subf %3, %5 : vector<36x256xf32>
    %7 = vector.broadcast %0 : f32 to vector<36x256xf32>
    %8 = arith.mulf %6, %7 : vector<36x256xf32>
    %cst = arith.constant dense<0xFF800000> : vector<36xf32>
    %9 = vector.multi_reduction <maximumf>, %8, %cst [1] : vector<36x256xf32> to vector<36xf32>
    %10 = vector.shape_cast %9 : vector<36xf32> to vector<36x1xf32>
    %11 = vector.broadcast %10 : vector<36x1xf32> to vector<36x256xf32>
    %12 = arith.subf %8, %11 : vector<36x256xf32>
    %13 = math.exp %12 : vector<36x256xf32>
    %cst_6 = arith.constant dense<0.000000e+00> : vector<36xf32>
    %14 = vector.multi_reduction <add>, %13, %cst_6 [1] : vector<36x256xf32> to vector<36xf32>
    %15 = vector.shape_cast %14 : vector<36xf32> to vector<36x1xf32>
    %c0_7 = arith.constant 0 : index
    %c0_8 = arith.constant 0 : index
    %16 = vector.load %arg4[%c0_7, %c0_8] : memref<36x256xf32, #tpu.memory_space<vmem>>, vector<36x256xf32>
    %17 = vector.broadcast %1 : f32 to vector<36x256xf32>
    %18 = arith.mulf %16, %17 : vector<36x256xf32>
    %cst_9 = arith.constant dense<0xFF800000> : vector<36xf32>
    %19 = vector.multi_reduction <maximumf>, %18, %cst_9 [1] : vector<36x256xf32> to vector<36xf32>
    %20 = vector.shape_cast %19 : vector<36xf32> to vector<36x1xf32>
    %21 = vector.broadcast %20 : vector<36x1xf32> to vector<36x256xf32>
    %22 = arith.subf %18, %21 : vector<36x256xf32>
    %23 = math.exp %22 : vector<36x256xf32>
    %cst_10 = arith.constant dense<0.000000e+00> : vector<36xf32>
    %24 = vector.multi_reduction <add>, %23, %cst_10 [1] : vector<36x256xf32> to vector<36xf32>
    %25 = vector.shape_cast %24 : vector<36xf32> to vector<36x1xf32>
    %26 = math.log %25 : vector<36x1xf32>
    %27 = arith.mulf %13, %22 : vector<36x256xf32>
    %cst_11 = arith.constant dense<0.000000e+00> : vector<36xf32>
    %28 = vector.multi_reduction <add>, %27, %cst_11 [1] : vector<36x256xf32> to vector<36xf32>
    %29 = vector.shape_cast %28 : vector<36xf32> to vector<36x1xf32>
    %30 = tpu.reciprocal %15 : vector<36x1xf32> -> vector<36x1xf32>
    %31 = arith.mulf %29, %30 : vector<36x1xf32>
    %32 = arith.subf %26, %31 : vector<36x1xf32>
    %cst_12 = arith.constant 0.000000e+00 : f32
    %33 = vector.broadcast %cst_12 : f32 to vector<36x1xf32>
    %34 = arith.cmpf one, %2, %33 : vector<36x1xf32>
    %35 = arith.extui %34 : vector<36x1xi1> to vector<36x1xi32>
    %36 = arith.sitofp %35 : vector<36x1xi32> to vector<36x1xf32>
    %37 = vector.broadcast %36 : vector<36x1xf32> to vector<36x256xf32>
    %38 = arith.mulf %3, %37 : vector<36x256xf32>
    %cst_13 = arith.constant dense<0.000000e+00> : vector<256xf32>
    %39 = vector.multi_reduction <add>, %38, %cst_13 [0] : vector<36x256xf32> to vector<256xf32>
    %40 = vector.shape_cast %39 : vector<256xf32> to vector<1x256xf32>
    %41 = vector.shape_cast %40 : vector<1x256xf32> to vector<1x1x256xf32>
    %c0_14 = arith.constant 0 : index
    %c0_15 = arith.constant 0 : index
    %c0_16 = arith.constant 0 : index
    %42 = vector.load %arg7[%c0_14, %c0_15, %c0_16] : memref<1x1x256xf32, #tpu.memory_space<vmem>>, vector<1x1x256xf32>
    tpu.vector_store %arg7[%c0_14, %c0_15, %c0_16], %41 {strides = array<i32>} : memref<1x1x256xf32, #tpu.memory_space<vmem>>, vector<1x1x256xf32>,
    %43 = arith.mulf %32, %2 : vector<36x1xf32>
    %cst_17 = arith.constant dense<0.000000e+00> : vector<1xf32>
    %44 = vector.multi_reduction <add>, %43, %cst_17 [0] : vector<36x1xf32> to vector<1xf32>
    %45 = vector.shape_cast %44 : vector<1xf32> to vector<1x1xf32>
    %46 = vector.shape_cast %45 : vector<1x1xf32> to vector<1x1x1xf32>
    %c0_18 = arith.constant 0 : index
    %c0_19 = arith.constant 0 : index
    %c0_20 = arith.constant 0 : index
    %47 = vector.load %arg6[%c0_18, %c0_19, %c0_20] : memref<1x1x1xf32, #tpu.memory_space<vmem>>, vector<1x1x1xf32>
    tpu.vector_store %arg6[%c0_18, %c0_19, %c0_20], %46 {strides = array<i32>} : memref<1x1x1xf32, #tpu.memory_space<vmem>>, vector<1x1x1xf32>,
    return
  }
  func.func @transform_0(%arg0: i32) -> i32 {
    %c0_i32 = arith.constant 0 : i32
    %c0_i32_0 = arith.constant 0 : i32
    return %c0_i32 : i32
  }
  func.func @transform_1(%arg0: i32) -> (i32, i32) {
    %c0_i32 = arith.constant 0 : i32
    %c0_i32_0 = arith.constant 0 : i32
    return %arg0, %c0_i32 : i32, i32
  }
  func.func @transform_2(%arg0: i32) -> (i32, i32) {
    %c0_i32 = arith.constant 0 : i32
    %c0_i32_0 = arith.constant 0 : i32
    return %arg0, %c0_i32 : i32, i32
  }
  func.func @transform_3(%arg0: i32) -> (i32, i32) {
    %c0_i32 = arith.constant 0 : i32
    %c0_i32_0 = arith.constant 0 : i32
    return %arg0, %c0_i32 : i32, i32
  }
  func.func @transform_4(%arg0: i32) -> (i32, i32) {
    %c0_i32 = arith.constant 0 : i32
    %c0_i32_0 = arith.constant 0 : i32
    %c0_i32_1 = arith.constant 0 : i32
    return %c0_i32, %c0_i32_0 : i32, i32
  }
  func.func @transform_5(%arg0: i32) -> (i32, i32, i32) {
    %c0_i32 = arith.constant 0 : i32
    %c0_i32_0 = arith.constant 0 : i32
    %c0_i32_1 = arith.constant 0 : i32
    return %arg0, %c0_i32, %c0_i32_0 : i32, i32, i32
  }
  func.func @transform_6(%arg0: i32) -> (i32, i32, i32) {
    %c0_i32 = arith.constant 0 : i32
    %c0_i32_0 = arith.constant 0 : i32
    %c0_i32_1 = arith.constant 0 : i32
    return %arg0, %c0_i32, %c0_i32_0 : i32, i32, i32
  }
}

</mosaic_0001>

<bundles_post_ra>
// kernel: ibot_patch_loss.1
= control target key start
LH: loop header
LB: loop body
LE: loop exit
PB: predicated region body
PF: predicated region fallthrough
CT: control target
= control target key end

     0   :  { %12 = vsyncpa [#allocation4], 0  ;;  %s977_s0 = inlined_call_operand.vmem [shape: f32[2], index: 0, kind: input, shape index: {}]   ;;  %s978_s1 = inlined_call_operand.vmem [shape: f32[36,1], index: 1, kind: input, shape index: {}]   ;;  %s979_s2 = inlined_call_operand.vmem [shape: f32[36,256], index: 2, kind: input, shape index: {}]   ;;  %s980_s3 = inlined_call_operand.vmem [shape: f32[36,256], index: 3, kind: input, shape index: {}]   ;;  %s981_s4 = inlined_call_operand.vmem [shape: f32[1,256], index: 4, kind: input, shape index: {}]   ;;  %s982_s5 = inlined_call_operand.hbm [shape: f32[1,1,1], index: 5, kind: output, shape index: {0}]   ;;  %s983_s6 = inlined_call_operand.vmem [shape: f32[1,1,256], index: 6, kind: output, shape index: {1}]  }
   0x1   :  { %13 = vsyncpa [#allocation3], 0  ;;  %s19_s23 = sshll.u32 %s977_s0, 4  ;;  %s598_s24 = smov [#allocation2]   ;;  %s20_s23 = int_to_ptr.vmem [resolvable:$true] %s19_s23 }
   0x2   :  { %22 = dma.vmem_to_smem %s20_s23, 16, %s598_s24, [#allocation4]  }
   0x3   :  { %594 = dma.done.wait [#allocation4], 16  }
   0x4   :  { %595 = vsyncadd [#allocation4], 4294967280 }
   0x5   :  { %35 = sfence }
   0x6   :  { %s475_s25 = sld [smem:[#allocation2 + $0x1]]  ;;  %v643_v0 = vld [vmem:[%s979_s2 + $0x20] sm:$0xff]  ;;  %v648_v1 = vld [vmem:[%s979_s2 + $0x28] sm:$0xff]  ;;  %v671_v8 = vld [vmem:[%s979_s2 + $0x30] sm:$0xff]  ;;  %vm92_vm0 = vcmask 1043456  }
   0x7   :  { %s36_s28 = sld [smem:[#allocation2]]  ;;  %v53_v2 = vld [vmem:[%s981_s4] sm:$0x3]  ;;  %v661_v6 = vld [vmem:[%s979_s2 + $0x8] sm:$0xff]  ;;  %v681_v10 = vld [vmem:[%s979_s2 + $0x38] sm:$0xff] }
   0x8   :  { %v656_v3 = vld [vmem:[%s979_s2] sm:$0xff]  ;;  %v55_v4 = vperm.slane %v53_v2, 0  ;;  %v56_v5 = vperm.slane %v53_v2, 1  ;;  %v676_v9 = vld [vmem:[%s979_s2 + $0x48] sm:$0xf]  ;;  %v686_v11 = vld [vmem:[%s979_s2 + $0x10] sm:$0xff] }
   0x9   :  { %v666_v7 = vld [vmem:[%s979_s2 + $0x40] sm:$0xf]  ;;  %v146_v13 = vld [vmem:[%s980_s3 + $0x8] sm:$0xff]  ;;  %v701_v18 = vld [vmem:[%s979_s2 + $0x18] sm:$0xff] }
   0xa   :  { %v145_v12 = vld [vmem:[%s980_s3] sm:$0xff]  ;;  %v63_v14 = vsub.f32 %v643_v0, %v55_v4  ;;  %v64_v15 = vsub.f32 %v648_v1, %v56_v5  ;;  %v59_v16 = vsub.f32 %v656_v3, %v55_v4  ;;  %v60_v17 = vsub.f32 %v661_v6, %v56_v5  ;;  %v151_v47 = vld [vmem:[%s980_s3 + $0x30] sm:$0xff]  ;;  %v152_v48 = vld [vmem:[%s980_s3 + $0x38] sm:$0xff] }
   0xb   :  { %v67_v19 = vsub.f32 %v666_v7, %v55_v4  ;;  %v68_v20 = vsub.f32 %v676_v9, %v56_v5  ;;  %v65_v22 = vsub.f32 %v671_v8, %v55_v4  ;;  %v66_v23 = vsub.f32 %v681_v10, %v56_v5  ;;  %v149_v49 = vld [vmem:[%s980_s3 + $0x20] sm:$0xff]  ;;  %v150_v50 = vld [vmem:[%s980_s3 + $0x28] sm:$0xff]  ;;  %v147_v51 = vld [vmem:[%s980_s3 + $0x10] sm:$0xff] }
   0xc   :  { %v155_v21 = vstv %s475_s25  ;;  %v61_v24 = vsub.f32 %v686_v11, %v55_v4  ;;  %v62_v28 = vsub.f32 %v701_v18, %v56_v5  ;;  %v148_v52 = vld [vmem:[%s980_s3 + $0x18] sm:$0xff]  ;;  %v153_v59 = vld [vmem:[%s980_s3 + $0x40] sm:$0xf]  ;;  %v154_v60 = vld [vmem:[%s980_s3 + $0x48] sm:$0xf]  ;;  %s461_s25 = sshll.u32 %s982_s5, 4  ;;  %s462_s25 = int_to_ptr.hbm [resolvable:$true] %s461_s25 }
   0xd   :  { %v156_v25 = vmul.f32 %v155_v21, %v145_v12  ;;  %v157_v26 = vmul.f32 %v155_v21, %v146_v13  ;;  %v69_v27 = vstv %s36_s28  ;;  %v747_v53 = vmul.f32 %v155_v21, %v151_v47 }
   0xe   :  { %v74_v29 = vmul.f32 %v69_v27, %v63_v14  ;;  %v75_v30 = vmul.f32 %v69_v27, %v64_v15  ;;  %v70_v31 = vmul.f32 %v69_v27, %v59_v16  ;;  %v71_v32 = vmul.f32 %v69_v27, %v60_v17 }
   0xf   :  { %v166_v33 = vmax.f32 %v156_v25, %v157_v26  ;;  %v709_v34 = vmul.f32 %v69_v27, %v67_v19  ;;  %v711_v35 = vmul.f32 %v69_v27, %v68_v20  ;;  %v713_v38 = vmul.f32 %v69_v27, %v65_v22 }
  0x10   :  { %v86_v36 = vmax.f32 %v74_v29, %v75_v30  ;;  %v80_v37 = vmax.f32 %v70_v31, %v71_v32  ;;  %v715_v39 = vmul.f32 %v69_v27, %v66_v23  ;;  %v721_v42 = vmul.f32 %v69_v27, %v61_v24 }
  0x11   :  { %167 = vmax.xlane.f32.xlu2 %v166_v33  ;;  %v93_v40 = vsel %vm92_vm0, %v709_v34, -inf  ;;  %v94_v41 = vsel %vm92_vm0, %v711_v35, -inf  ;;  %v723_v43 = vmul.f32 %v69_v27, %v62_v28  ;;  %v749_v54 = vmul.f32 %v155_v21, %v152_v48 }
  0x12   :  { %87 = vmax.xlane.f32.xlu1 %v86_v36  ;;  %81 = vmax.xlane.f32.xlu0 %v80_v37  ;;  %v95_v44 = vmax.f32 %v93_v40, %v94_v41  ;;  %v89_v45 = vmax.f32 %v713_v38, %v715_v39  ;;  %v751_v55 = vmul.f32 %v155_v21, %v149_v49 }
  0x13   :  { %v83_v46 = vmax.f32 %v721_v42, %v723_v43  ;;  %v753_v56 = vmul.f32 %v155_v21, %v150_v50  ;;  %v755_v57 = vmul.f32 %v155_v21, %v147_v51  ;;  %v757_v58 = vmul.f32 %v155_v21, %v148_v52 }
  0x14   :  { %v175_v61 = vmax.f32 %v747_v53, %v749_v54  ;;  %v771_v2 = vmul.f32 %v155_v21, %v153_v59  ;;  %v773_v4 = vmul.f32 %v155_v21, %v154_v60 }
  0x15   :  { %v172_v62 = vmax.f32 %v751_v55, %v753_v56  ;;  %v169_v63 = vmax.f32 %v755_v57, %v757_v58 }
  0x16   :  { %v178_v5 = vsel %vm92_vm0, %v771_v2, -inf  ;;  %v179_v12 = vsel %vm92_vm0, %v773_v4, -inf }
  0x17   :  { %v180_v13 = vmax.f32 %v178_v5, %v179_v12 }
  0x19   :  { %96 = vmax.xlane.f32.xlu2 %v95_v44 }
  0x1a   :  { %90 = vmax.xlane.f32.xlu1 %v89_v45  ;;  %84 = vmax.xlane.f32.xlu0 %v83_v46 }
  0x21   :  { %176 = vmax.xlane.f32.xlu2 %v175_v61 }
  0x22   :  { %173 = vmax.xlane.f32.xlu1 %v172_v62  ;;  %170 = vmax.xlane.f32.xlu0 %v169_v63 }
  0x2a   :  { %181 = vmax.xlane.f32.xlu0 %v180_v13 }
  0x84   :  { %v168_v14 = vpop.xlane.xlu2 %167 }
  0x85   :  { %v88_v15 = vpop.xlane.xlu1 %87  ;;  %v82_v16 = vpop.xlane.xlu0 %81  ;;  %v779_v21 = vsub.f32 %v156_v25, %v168_v14  ;;  %v781_v23 = vsub.f32 %v157_v26, %v168_v14 }
  0x86   :  { %v102_v17 = vsub.f32 %v74_v29, %v88_v15  ;;  %v103_v19 = vsub.f32 %v75_v30, %v88_v15  ;;  %v98_v20 = vsub.f32 %v70_v31, %v82_v16  ;;  %v99_v22 = vsub.f32 %v71_v32, %v82_v16 }
  0x87   :  { %v193_v36 = vmul.f32 1.442695, %v779_v21  ;;  %v195_v37 = vmul.f32 1.442695, %v781_v23 }
  0x88   :  { %v116_v24 = vmul.f32 1.442695, %v102_v17  ;;  %v118_v27 = vmul.f32 1.442695, %v103_v19  ;;  %v108_v28 = vmul.f32 1.442695, %v98_v20 }
  0x89   :  { %v110_v33 = vmul.f32 1.442695, %v99_v22 }
  0x8a   :  { %498 = vpow2.f32 %v116_v24 }
  0x8b   :  { %500 = vpow2.f32 %v118_v27 }
  0x8c   :  { %v97_v40 = vpop.xlane.xlu2 %96  ;;  %502 = vpow2.f32 %v108_v28 }
  0x8d   :  { %v91_v29 = vpop.xlane.xlu1 %90  ;;  %v85_v30 = vpop.xlane.xlu0 %84  ;;  %504 = vpow2.f32 %v110_v33  ;;  %v106_v13 = vsub.f32 %v709_v34, %v97_v40 }
  0x8e   :  { %v104_v25 = vsub.f32 %v713_v38, %v91_v29  ;;  %v105_v26 = vsub.f32 %v715_v39, %v91_v29  ;;  %v100_v31 = vsub.f32 %v721_v42, %v85_v30  ;;  %506 = vpow2.f32 %v193_v36 }
  0x8f   :  { %v101_v32 = vsub.f32 %v723_v43, %v85_v30  ;;  %508 = vpow2.f32 %v195_v37  ;;  %v124_v22 = vmul.f32 1.442695, %v106_v13  ;;  %v599_v30 = vmov 0  }
  0x90   :  { %v120_v41 = vmul.f32 1.442695, %v104_v25  ;;  %v122_v44 = vmul.f32 1.442695, %v105_v26  ;;  %v789_v45 = vpop.eup %498  ;;  %v112_v46 = vmul.f32 1.442695, %v100_v31  ;;  %485 = vset.pattern.permute.xlu0 %v599_v30  ;;  %497 = vset.pattern.permute.xlu1 %v599_v30 }
  0x91   :  { %v791_v47 = vpop.eup %500  ;;  %v114_v48 = vmul.f32 1.442695, %v101_v32  ;;  %491 = vset.pattern.permute.xlu2 %v599_v30 }
  0x92   :  { %v793_v49 = vpop.eup %502  ;;  %510 = vpow2.f32 %v120_v41  ;;  %v134_v38 = vadd.f32 %v791_v47, %v789_v45 }
  0x93   :  { %v797_v39 = vpop.eup %504  ;;  %512 = vpow2.f32 %v122_v44 }
  0x94   :  { %v177_v42 = vpop.xlane.xlu2 %176  ;;  %v507_v43 = vpop.eup %506  ;;  %514 = vpow2.f32 %v112_v46  ;;  %135 = vadd.xlane.f32.xlu0 %v134_v38  ;;  %v128_v50 = vadd.f32 %v797_v39, %v793_v49 }
  0x95   :  { %v802_v51 = vsub.f32 %v747_v53, %v177_v42  ;;  %v805_v52 = vsub.f32 %v749_v54, %v177_v42  ;;  %v174_v59 = vpop.xlane.xlu1 %173  ;;  %v171_v60 = vpop.xlane.xlu0 %170  ;;  %516 = vpow2.f32 %v114_v48 }
  0x96   :  { %v509_v61 = vpop.eup %508  ;;  %v808_v62 = vsub.f32 %v751_v55, %v174_v59  ;;  %v811_v63 = vsub.f32 %v753_v56, %v174_v59  ;;  %v185_v5 = vsub.f32 %v755_v57, %v171_v60  ;;  %129 = vadd.xlane.f32.xlu1 %v128_v50  ;;  %v186_v54 = vsub.f32 %v757_v58, %v171_v60 }
  0x97   :  { %v205_v12 = vmul.f32 1.442695, %v802_v51  ;;  %v207_v53 = vmul.f32 1.442695, %v805_v52  ;;  %v107_v56 = vsub.f32 %v711_v35, %v97_v40  ;;  %v213_v57 = vadd.f32 %v509_v61, %v507_v43 }
  0x98   :  { %v201_v14 = vmul.f32 1.442695, %v808_v62  ;;  %v203_v15 = vmul.f32 1.442695, %v811_v63  ;;  %v820_v55 = vpop.eup %510  ;;  %v197_v16 = vmul.f32 1.442695, %v185_v5 }
  0x99   :  { %518 = vpow2.f32 %v205_v12  ;;  %v823_v17 = vpop.eup %512  ;;  %v199_v19 = vmul.f32 1.442695, %v186_v54  ;;  %v126_v24 = vmul.f32 1.442695, %v107_v56  ;;  %v844_v56 = vld [vmem:[%s978_s1] sm:$0xff] }
  0x9a   :  { %520 = vpow2.f32 %v207_v53  ;;  %v515_v20 = vpop.eup %514  ;;  %v137_v34 = vadd.f32 %v823_v17, %v820_v55  ;;  %vm347_vm1 = vcmp.ne.f32.partialorder %v844_v56, 0.0 }
  0x9b   :  { %522 = vpow2.f32 %v201_v14  ;;  %v517_v58 = vpop.eup %516  ;;  %v242_v48 = vmul.f32 %v515_v20, %v185_v5  ;;  %v240_v5 = vmul.f32 %v793_v49, %v779_v21  ;;  %v244_v14 = vmul.f32 %v789_v45, %v808_v62 }
  0x9c   :  { %524 = vpow2.f32 %v203_v15  ;;  %214 = vadd.xlane.f32.xlu0 %v213_v57  ;;  %v131_v27 = vadd.f32 %v517_v58, %v515_v20  ;;  %v243_v38 = vmul.f32 %v517_v58, %v186_v54  ;;  %v241_v54 = vmul.f32 %v797_v39, %v781_v23 }
  0x9d   :  { %526 = vpow2.f32 %v197_v16  ;;  %v182_v35 = vpop.xlane.xlu0 %181  ;;  %v245_v15 = vmul.f32 %v791_v47, %v811_v63  ;;  %v849_v16 = vld [vmem:[%s978_s1 + $0x8] sm:$0xff]  ;;  %v246_v45 = vmul.f32 %v820_v55, %v802_v51  ;;  %v247_v47 = vmul.f32 %v823_v17, %v805_v52  ;;  %v862_v51 = vld [vmem:[%s978_s1 + $0x10] sm:$0xff]  ;;  %v867_v52 = vld [vmem:[%s978_s1 + $0x18] sm:$0xff] }
  0x9e   :  { %528 = vpow2.f32 %v199_v19  ;;  %v191_v28 = vsub.f32 %v771_v2, %v182_v35  ;;  %v192_v33 = vsub.f32 %v773_v4, %v182_v35  ;;  %138 = vadd.xlane.f32.xlu1 %v137_v34  ;;  %132 = vadd.xlane.f32.xlu2 %v131_v27  ;;  %v253_v53 = vadd.f32 %v243_v38, %v242_v48  ;;  %v874_v55 = vld [vmem:[%s978_s1 + $0x20] sm:$0xf]  ;;  %s601_s1 = smov [#allocation5]  }
  0x9f   :  { %v519_v36 = vpop.eup %518  ;;  %530 = vpow2.f32 %v124_v22  ;;  %v250_v21 = vadd.f32 %v241_v54, %v240_v5  ;;  %v256_v49 = vadd.f32 %v245_v15, %v244_v14  ;;  %vm348_vm2 = vcmp.ne.f32.partialorder %v849_v16, 0.0  ;;  %s459_s26 = sshll.u32 %s601_s1, 4  ;;  %s460_s26 = int_to_ptr.vmem [resolvable:$true] %s459_s26 }
  0xa0   :  { %v521_v37 = vpop.eup %520  ;;  %v209_v40 = vmul.f32 1.442695, %v191_v28  ;;  %v211_v29 = vmul.f32 1.442695, %v192_v33  ;;  %532 = vpow2.f32 %v126_v24  ;;  %v600_v63 = vmov 0.0  }
  0xa1   :  { %v523_v25 = vpop.eup %522  ;;  %v222_v26 = vadd.f32 %v521_v37, %v519_v36  ;;  %v476_v19 = vsel %vm347_vm1, 1.0, %v600_v63  ;;  %v477_v20 = vsel %vm348_vm2, 1.0, %v600_v63  ;;  %v259_v34 = vadd.f32 %v247_v47, %v246_v45 }
  0xa2   :  { %v525_v31 = vpop.eup %524  ;;  %534 = vpow2.f32 %v209_v40  ;;  %v486_v22 = vpack.i.bf16 %v477_v20, %v476_v19  ;;  %vm349_vm3 = vcmp.ne.f32.partialorder %v862_v51, 0.0  ;;  %vm350_vm4 = vcmp.ne.f32.partialorder %v867_v52, 0.0 }
  0xa3   :  { %v527_v32 = vpop.eup %526  ;;  %536 = vpow2.f32 %v211_v29  ;;  %v219_v2 = vadd.f32 %v525_v31, %v523_v25  ;;  %v478_v17 = vsel %vm349_vm3, 1.0, %v600_v63  ;;  %v479_v24 = vsel %vm350_vm4, 1.0, %v600_v63 }
  0xa4   :  { %v529_v4 = vpop.eup %528  ;;  %223 = vadd.xlane.f32.xlu0 %v222_v26  ;;  %vm351_vm5 = vcmp.ne.f32.partialorder %v874_v55, 0.0  ;;  %v492_v27 = vpack.i.bf16 %v479_v24, %v478_v17 }
  0xa5   :  { %v216_v41 = vadd.f32 %v529_v4, %v527_v32  ;;  %v531_v44 = vpop.eup %530  ;;  %v480_v35 = vsel %vm351_vm5, 1.0, %v600_v63 }
  0xa6   :  { %v533_v46 = vpop.eup %532  ;;  %220 = vadd.xlane.f32.xlu2 %v219_v2  ;;  %v140_v43 = vsel %vm92_vm0, %v531_v44, 0.0  ;;  %v248_v57 = vmul.f32 %v531_v44, %v191_v28 }
  0xa7   :  { %217 = vadd.xlane.f32.xlu1 %v216_v41  ;;  %v141_v50 = vsel %vm92_vm0, %v533_v46, 0.0  ;;  %v249_v23 = vmul.f32 %v533_v46, %v192_v33 }
  0xa8   :  { %v535_v42 = vpop.eup %534  ;;  %v142_v12 = vadd.f32 %v141_v50, %v140_v43  ;;  %v262_v39 = vsel %vm92_vm0, %v248_v57, 0.0 }
  0xa9   :  { %v537_v59 = vpop.eup %536  ;;  %v225_v60 = vsel %vm92_vm0, %v535_v42, 0.0  ;;  %v263_v62 = vsel %vm92_vm0, %v249_v23, 0.0 }
  0xaa   :  { %v226_v61 = vsel %vm92_vm0, %v537_v59, 0.0  ;;  %v264_v58 = vadd.f32 %v263_v62, %v262_v39 }
  0xab   :  { %v227_v13 = vadd.f32 %v226_v61, %v225_v60 }
  0xac   :  { %254 = vadd.xlane.f32.xlu0 %v253_v53 }
  0xae   :  { %143 = vadd.xlane.f32.xlu2 %v142_v12 }
  0xaf   :  { %228 = vadd.xlane.f32.xlu1 %v227_v13 }
  0xb6   :  { %251 = vadd.xlane.f32.xlu2 %v250_v21 }
  0xb7   :  { %257 = vadd.xlane.f32.xlu1 %v256_v49 }
  0xbe   :  { %260 = vadd.xlane.f32.xlu2 %v259_v34 }
  0xbf   :  { %265 = vadd.xlane.f32.xlu1 %v264_v58 }
  0xc0   :  { %487 = vperm.xlu0 %485, %v486_v22  }
  0xd6   :  { %493 = vperm.xlu2 %491, %v492_v27  }
  0xd8   :  { %384 = vperm.xlu1 %497, %v480_v35  }
 0x107   :  { %v877_v28 = vpop.xlane.xlu0 %135 }
 0x108   :  { %538 = vrcp.f32 %v877_v28  ;;  %vm300_vm7 = vweird.f32 %v877_v28  ;;  %v306_v53 = vand.u32 2147483648, %v877_v28  ;;  %v304_v62 = vand.u32 2147483647, %v877_v28 }
 0x109   :  { %v879_v33 = vpop.xlane.xlu1 %129 }
 0x10a   :  { %540 = vrcp.f32 %v879_v33  ;;  %v276_v47 = vand.u32 2147483647, %v879_v33  ;;  %v278_v39 = vand.u32 2147483648, %v879_v33  ;;  %vm272_vm13 = vweird.f32 %v879_v33 }
 0x10b   :  { %v307_v27 = vor.u32 1.1754944e-38, %v306_v53  ;;  %vm305_vm2 = vcmp.eq.f32.partialorder %v304_v62, 8.507059e+37 }
 0x10c   :  { %vm277_vm1 = vcmp.eq.f32.partialorder %v276_v47, 8.507059e+37 }
 0x10e   :  { %v885_v29 = vpop.eup %538 }
 0x10f   :  { %v215_v36 = vpop.xlane.xlu0 %214  ;;  %v296_v25 = vmul.f32 %v885_v29, %v877_v28  ;;  %vm301_vm9 = vweird.f32 %v885_v29  ;;  %v279_v28 = vor.u32 1.1754944e-38, %v278_v39 }
 0x110   :  { %v887_v30 = vpop.eup %540  ;;  %vm917_vm14 = vmor %vm300_vm7, %vm301_vm9  ;;  %vm435_vm7 = vcmask 7168  }
 0x111   :  { %v883_v37 = vpop.xlane.xlu1 %138  ;;  %v133_v40 = vpop.xlane.xlu2 %132  ;;  %v268_v26 = vmul.f32 %v887_v30, %v879_v33  ;;  %v297_v2 = vsub.f32 1.0, %v296_v25  ;;  %vm273_vm11 = vweird.f32 %v887_v30 }
 0x112   :  { %542 = vrcp.f32 %v133_v40  ;;  %v290_v43 = vand.u32 2147483647, %v133_v40  ;;  %v292_v50 = vand.u32 2147483648, %v133_v40  ;;  %vm286_vm8 = vweird.f32 %v133_v40  ;;  %vm923_vm15 = vmor %vm272_vm13, %vm273_vm11 }
 0x113   :  { %544 = vrcp.f32 %v883_v37  ;;  %v269_v46 = vsub.f32 1.0, %v268_v26  ;;  %v298_v59 = vmul.f32 %v885_v29, %v297_v2  ;;  %vm314_vm4 = vweird.f32 %v883_v37 }
 0x114   :  { %546 = vlog2.f32 %v215_v36  ;;  %v293_v54 = vor.u32 1.1754944e-38, %v292_v50  ;;  %vm291_vm12 = vcmp.eq.f32.partialorder %v290_v43, 8.507059e+37  ;;  %v318_v43 = vand.u32 2147483647, %v883_v37 }
 0x115   :  { %v270_v61 = vmul.f32 %v887_v30, %v269_v46  ;;  %v299_v15 = vadd.f32 %v885_v29, %v298_v59  ;;  %vm452_vm13 = vcmask 0  }
 0x116   :  { %vm319_vm9 = vcmp.eq.f32.partialorder %v318_v43, 8.507059e+37 }
 0x117   :  { %v224_v31 = vpop.xlane.xlu0 %223  ;;  %v271_v57 = vadd.f32 %v887_v30, %v270_v61  ;;  %v303_v58 = vsel %vm917_vm14, %v885_v29, %v299_v15  ;;  %vm422_vm14 = vcmask 1040384  }
 0x118   :  { %v543_v32 = vpop.eup %542  ;;  %v308_v25 = vsel %vm305_vm2, %v307_v27, %v303_v58 }
 0x119   :  { %v221_v4 = vpop.xlane.xlu2 %220  ;;  %v894_v44 = vpop.eup %544  ;;  %v282_v48 = vmul.f32 %v543_v32, %v133_v40  ;;  %vm287_vm6 = vweird.f32 %v543_v32  ;;  %v275_v24 = vsel %vm923_vm15, %v887_v30, %v271_v57 }
 0x11a   :  { %v218_v41 = vpop.xlane.xlu1 %217  ;;  %v310_v42 = vmul.f32 %v894_v44, %v883_v37  ;;  %548 = vlog2.f32 %v221_v4  ;;  %vm288_vm10 = vmor %vm286_vm8, %vm287_vm6  ;;  %v547_v21 = vpop.eup %546  ;;  %v280_v29 = vsel %vm277_vm1, %v279_v28, %v275_v24  ;;  %vm315_vm3 = vweird.f32 %v894_v44 }
 0x11b   :  { %v283_v38 = vsub.f32 1.0, %v282_v48  ;;  %550 = vlog2.f32 %v218_v41  ;;  %v231_v35 = vmul.f32 0.6931472, %v547_v21  ;;  %vm941_vm5 = vmor %vm314_vm4, %vm315_vm3 }
 0x11c   :  { %v311_v13 = vsub.f32 1.0, %v310_v42 }
 0x11d   :  { %v284_v60 = vmul.f32 %v543_v32, %v283_v38  ;;  %v320_v38 = vand.u32 2147483648, %v883_v37 }
 0x11e   :  { %v312_v22 = vmul.f32 %v894_v44, %v311_v13 }
 0x11f   :  { %v285_v12 = vadd.f32 %v543_v32, %v284_v60  ;;  %v255_v45 = vpop.xlane.xlu0 %254  ;;  %v321_v37 = vor.u32 1.1754944e-38, %v320_v38 }
 0x120   :  { %v549_v63 = vpop.eup %548  ;;  %v313_v4 = vadd.f32 %v894_v44, %v312_v22 }
 0x121   :  { %v903_v5 = vpop.xlane.xlu2 %143  ;;  %v289_v49 = vsel %vm288_vm10, %v543_v32, %v285_v12  ;;  %v551_v20 = vpop.eup %550  ;;  %v235_v36 = vmul.f32 0.6931472, %v549_v63 }
 0x122   :  { %v229_v14 = vpop.xlane.xlu1 %228  ;;  %552 = vrcp.f32 %v903_v5  ;;  %v294_v23 = vsel %vm291_vm12, %v293_v54, %v289_v49  ;;  %v233_v40 = vmul.f32 0.6931472, %v551_v20  ;;  %v334_v50 = vand.u32 2147483648, %v903_v5 }
 0x123   :  { %v338_v17 = vmul.f32 %v294_v23, %v255_v45  ;;  %554 = vlog2.f32 %v224_v31  ;;  %v332_v61 = vand.u32 2147483647, %v903_v5  ;;  %v317_v54 = vsel %vm941_vm5, %v894_v44, %v313_v4 }
 0x124   :  { %556 = vlog2.f32 %v229_v14  ;;  %vm328_vm8 = vweird.f32 %v903_v5  ;;  %v335_v57 = vor.u32 1.1754944e-38, %v334_v50  ;;  %vm443_vm12 = vcmask 3072  }
 0x125   :  { %v343_v30 = vsub.f32 %v233_v40, %v338_v17  ;;  %vm333_vm11 = vcmp.eq.f32.partialorder %v332_v61, 8.507059e+37 }
 0x127   :  { %v431_v53 = vmul.f32 %v343_v30, %v849_v16  ;;  %v322_v16 = vsel %vm319_vm9, %v321_v37, %v317_v54 }
 0x128   :  { %v553_v33 = vpop.eup %552 }
 0x129   :  { %v324_v26 = vmul.f32 %v553_v33, %v903_v5  ;;  %v252_v32 = vpop.xlane.xlu2 %251  ;;  %vm329_vm6 = vweird.f32 %v553_v33  ;;  %v555_v12 = vpop.eup %554  ;;  %v437_v44 = vsel %vm435_vm7, %v431_v53, 0.0 }
 0x12a   :  { %v258_v2 = vpop.xlane.xlu1 %257  ;;  %v337_v41 = vmul.f32 %v280_v29, %v252_v32  ;;  %v557_v15 = vpop.eup %556  ;;  %vm330_vm10 = vmor %vm328_vm8, %vm329_vm6  ;;  %v237_v47 = vmul.f32 0.6931472, %v555_v12 }
 0x12b   :  { %v339_v46 = vmul.f32 %v308_v25, %v258_v2  ;;  %v325_v48 = vsub.f32 1.0, %v324_v26  ;;  %v239_v63 = vmul.f32 0.6931472, %v557_v15 }
 0x12c   :  { %v342_v31 = vsub.f32 %v231_v35, %v337_v41 }
 0x12d   :  { %v344_v42 = vsub.f32 %v235_v36, %v339_v46  ;;  %v326_v60 = vmul.f32 %v553_v33, %v325_v48 }
 0x12e   :  { %v430_v13 = vmul.f32 %v342_v31, %v844_v56 }
 0x12f   :  { %v327_v14 = vadd.f32 %v553_v33, %v326_v60  ;;  %v432_v49 = vmul.f32 %v344_v42, %v862_v51 }
 0x130   :  { %v436_v21 = vsel %vm435_vm7, %v430_v13, 0.0 }
 0x131   :  { %v261_v23 = vpop.xlane.xlu2 %260  ;;  %v331_v56 = vsel %vm330_vm10, %v553_v33, %v327_v14  ;;  %v438_v5 = vadd.f32 %v437_v44, %v436_v21  ;;  %v439_v20 = vsel %vm435_vm7, %v432_v49, 0.0 }
 0x132   :  { %v266_v45 = vpop.xlane.xlu1 %265  ;;  %v340_v39 = vmul.f32 %v322_v16, %v261_v23  ;;  %v336_v62 = vsel %vm333_vm11, %v335_v57, %v331_v56  ;;  %v488_v24 = vpop.permute.xlu0 %487 }
 0x133   :  { %v341_v19 = vmul.f32 %v336_v62, %v266_v45  ;;  %v440_v22 = vadd.f32 %v439_v20, %v438_v5  ;;  %v490_v33 = vunpack.i.h.bf16 %v488_v24  ;;  %v489_v36 = vunpack.i.l.bf16 %v488_v24 }
 0x134   :  { %v345_v34 = vsub.f32 %v237_v47, %v340_v39 }
 0x135   :  { %v346_v51 = vsub.f32 %v239_v63, %v341_v19  ;;  %v389_v29 = vmul.f32 %v490_v33, %v686_v11  ;;  %v387_v32 = vmul.f32 %v489_v36, %v656_v3  ;;  %v388_v2 = vmul.f32 %v489_v36, %v661_v6 }
 0x136   :  { %v433_v58 = vmul.f32 %v345_v34, %v867_v52  ;;  %v390_v52 = vmul.f32 %v490_v33, %v701_v18 }
 0x137   :  { %v434_v17 = vmul.f32 %v346_v51, %v874_v55  ;;  %v397_v41 = vadd.f32 %v389_v29, %v387_v32 }
 0x138   :  { %v441_v27 = vsel %vm435_vm7, %v433_v58, 0.0  ;;  %v408_v48 = vadd.f32 %v390_v52, %v388_v2 }
 0x139   :  { %v442_v35 = vadd.f32 %v441_v27, %v440_v22  ;;  %v444_v28 = vsel %vm443_vm12, %v434_v17, 0.0  ;;  %v494_v25 = vpop.permute.xlu2 %493 }
 0x13a   :  { %v495_v4 = vunpack.i.l.bf16 %v494_v25  ;;  %v496_v46 = vunpack.i.h.bf16 %v494_v25 }
 0x13b   :  { %v445_v40 = vadd.f32 %v444_v28, %v442_v35 }
 0x13c   :  { %v391_v38 = vmul.f32 %v495_v4, %v643_v0  ;;  %v392_v31 = vmul.f32 %v495_v4, %v648_v1  ;;  %v393_v6 = vmul.f32 %v496_v46, %v671_v8  ;;  %v394_v11 = vmul.f32 %v496_v46, %v681_v10 }
 0x13d   :  { %v446_v26 = vrot.slane %v445_v40, 4 }
 0x13e   :  { %v398_v18 = vadd.f32 %v397_v41, %v391_v38  ;;  %v409_v43 = vadd.f32 %v408_v48, %v392_v31 }
 0x13f   :  { %v447_v55 = vadd.f32 %v446_v26, %v445_v40 }
 0x140   :  { %v399_v60 = vadd.f32 %v398_v18, %v393_v6  ;;  %v410_v61 = vadd.f32 %v409_v43, %v394_v11 }
 0x141   :  { %v448_v30 = vrot.slane %v447_v55, 2 }
 0x143   :  { %v449_v42 = vadd.f32 %v448_v30, %v447_v55 }
 0x145   :  { %v450_v3 = vrot.slane %v449_v42, 1 }
 0x147   :  { %v451_v50 = vadd.f32 %v450_v3, %v449_v42 }
 0x149   :  { %453 = vst.msk [vmem:[#allocation5] sm:$0x1] %vm452_vm13, %v451_v50 }
 0x14a   :  { %v385_v0 = vpop.permute.xlu1 %384  ;;  %464 = dma.vmem_to_hbm [thread:$0]  %s460_s26, 16, %s462_s25, [#allocation3]  }
 0x14b   :  { %v395_v1 = vmul.f32 %v385_v0, %v666_v7  ;;  %v396_v59 = vmul.f32 %v385_v0, %v676_v9  ;;  %v425_v7 = vlaneseq }
 0x14d   :  { %v400_v12 = vsel %vm92_vm0, %v395_v1, 0.0  ;;  %v411_v8 = vsel %vm92_vm0, %v396_v59, 0.0  ;;  %vm427_vm15 = vcmp.lt.s32.totalorder %v425_v7, 256 }
 0x14e   :  { %v401_v53 = vadd.f32 %v400_v12, %v399_v60  ;;  %v412_v10 = vadd.f32 %v411_v8, %v410_v61 }
 0x150   :  { %v402_v13 = vrot.slane %v401_v53, 4  ;;  %v413_v54 = vrot.slane %v412_v10, 4 }
 0x152   :  { %v403_v37 = vadd.f32 %v402_v13, %v401_v53  ;;  %v414_v14 = vadd.f32 %v413_v54, %v412_v10 }
 0x154   :  { %v404_v15 = vrot.slane %v403_v37, 2  ;;  %v415_v21 = vrot.slane %v414_v14, 2 }
 0x156   :  { %v405_v49 = vadd.f32 %v404_v15, %v403_v37  ;;  %v416_v57 = vadd.f32 %v415_v21, %v414_v14 }
 0x158   :  { %v406_v16 = vrot.slane %v405_v49, 1  ;;  %v417_v9 = vrot.slane %v416_v57, 1 }
 0x15a   :  { %v418_v23 = vadd.f32 %v417_v9, %v416_v57  ;;  %v407_v56 = vadd.f32 %v406_v16, %v405_v49 }
 0x15c   :  { %v421_v45 = vrot.slane %v418_v23, 7 }
 0x15e   :  { %v423_v47 = vsel %vm422_vm14, %v407_v56, %v421_v45 }
 0x15f   :  { %429 = vst.msk [vmem:[%s983_s6] sm:$0x3] %vm427_vm15, %v423_v47 }
 0x160   :  { %596 = dma.done.wait [#allocation3], 16  }
 0x161   :  { %597 = vsyncadd [#allocation3], 4294967280 }
 0x162   :  { %473 = vsyncpa [#allocation3], 1 }
 0x163   :  { %474 = vsyncpa [#allocation4], 1 }

</bundles_post_ra>
